<compile_context>
chip_gen: v5e
topology: v5e:2x2
jax: 0.10.0
libtpu: 0.0.40
codegen_flags: <defaults>
</compile_context>

<pallas_src>
import jax
import jax.numpy as jnp
from jax import lax
from jax.experimental import pallas as pl
from jax.experimental.pallas import tpu as pltpu

EPS = 1e-5
_SUBLANE = 8  # f32 sublane quantum


def _layernorm_kernel(x_ref, wb_ref, o_ref):
    # x_ref: (tile_rows, D); wb_ref: (2, D) = [weight; bias]; o_ref: (tile_rows, D)
    x = x_ref[...].astype(jnp.float32)
    mean = jnp.mean(x, axis=-1, keepdims=True)
    centered = x - mean
    var = jnp.mean(centered * centered, axis=-1, keepdims=True)
    inv = lax.rsqrt(var + EPS)
    w = wb_ref[0:1, :].astype(jnp.float32)
    b = wb_ref[1:2, :].astype(jnp.float32)
    o_ref[...] = (centered * inv * w + b).astype(o_ref.dtype)


def _choose_tile_rows(total_rows, d, itemsize, target_block_bytes=2 << 20):
    # ~2 MiB blocks: double-buffered input + output ~= 4 * 2 MiB = 8 MiB, which
    # fits the v7x 32 MiB default scoped-VMEM budget with room to spare, while
    # being big enough for high HBM utilization on v5e/v6e.
    t = max(_SUBLANE,
            (target_block_bytes // max(1, d * itemsize)) // _SUBLANE * _SUBLANE)
    if total_rows >= 2 * _SUBLANE:
        # Guarantee >=2 grid steps so v7x can shard the grid across its 2 TCs.
        half = max(_SUBLANE, (total_rows // 2) // _SUBLANE * _SUBLANE)
        t = min(t, half)
    return min(t, max(_SUBLANE, total_rows))


def layernorm_rows_pallas(x2, weight, bias, *, tile_rows=None):
    """LayerNorm over the last dim of a flattened (rows, D) array, one pallas_call."""
    rows, D = x2.shape
    wb = jnp.stack([weight, bias]).astype(jnp.float32).reshape(2, D)

    if tile_rows is None:
        tile_rows = _choose_tile_rows(rows, D, x2.dtype.itemsize)
    assert tile_rows % _SUBLANE == 0 or tile_rows == rows, (
        "tile_rows must be a multiple of 8 (f32 sublane) or equal to rows")

    padded_rows = pl.cdiv(rows, tile_rows) * tile_rows
    if padded_rows != rows:
        x2 = jnp.pad(x2, ((0, padded_rows - rows), (0, 0)))
    grid = (padded_rows // tile_rows,)

    out = pl.pallas_call(
        _layernorm_kernel,
        out_shape=jax.ShapeDtypeStruct((padded_rows, D), x2.dtype),
        grid=grid,
        in_specs=[
            pl.BlockSpec((tile_rows, D), lambda i: (i, 0)),
            pl.BlockSpec((2, D), lambda i: (0, 0)),  # weight/bias stay resident
        ],
        out_specs=pl.BlockSpec((tile_rows, D), lambda i: (i, 0)),
        compiler_params=pltpu.CompilerParams(
            dimension_semantics=("parallel",),
        ),
    )(x2, wb)

    if padded_rows != rows:
        out = out[:rows]
    return out


def layernorm_pallas(x, weight, bias, *, tile_rows=None):
    """LayerNorm over the last dim of x (any leading shape)."""
    orig_shape = x.shape
    D = orig_shape[-1]
    rows = 1
    for s in orig_shape[:-1]:
        rows *= s
    out = layernorm_rows_pallas(x.reshape(rows, D), weight, bias,
                                tile_rows=tile_rows)
    return out.reshape(orig_shape)


class PreNormPallas:
    """Mirrors PreNorm: applies shared LayerNorm(dim) to 7 inputs, then fn."""

    def __init__(self, dim, fn, key):
        # nn.LayerNorm default init is weight=1, bias=0; perturbed slightly so
        # the affine path is exercised in the correctness check.
        kw, kb = jax.random.split(key)
        self.weight = jnp.ones((dim,), jnp.float32) + 0.01 * jax.random.normal(
            kw, (dim,), jnp.float32)
        self.bias = 0.01 * jax.random.normal(kb, (dim,), jnp.float32)
        self.fn = fn

    def __call__(self, x, x_delta, x_theta, x_alpha, x_beta, x_gamma, x_upper,
                 **kwargs):
        streams = (x, x_delta, x_theta, x_alpha, x_beta, x_gamma, x_upper)
        shape = streams[0].shape
        D = shape[-1]
        if all(t.shape == shape for t in streams):
            # Fast path: fuse all 7 LayerNorms into a single kernel launch.
            stacked = jnp.stack(streams).reshape(-1, D)
            normed_flat = layernorm_rows_pallas(stacked, self.weight, self.bias)
            normed = tuple(normed_flat.reshape((len(streams),) + shape))
        else:
            # Fallback for heterogeneous shapes: per-stream launches.
            normed = tuple(
                layernorm_pallas(t, self.weight, self.bias) for t in streams)
        return self.fn(*normed, **kwargs)


# TODO(synk): `fn` is an arbitrary wrapped module in the original code (e.g. an
# attention or feed-forward block); it is not defined by PreNorm itself, so a
# pass-through is used here.
def _identity_fn(*xs, **kwargs):
    return xs


if __name__ == "__main__":
    key = jax.random.PRNGKey(0)
    k_params, *k_inputs = jax.random.split(key, 8)

    # Small shapes consistent with the module; dim=128 keeps stores lane-dense.
    batch, seq, dim = 2, 8, 128
    inputs = [
        jax.random.normal(k, (batch, seq, dim), jnp.float32) for k in k_inputs
    ]

    module = PreNormPallas(dim, _identity_fn, k_params)
    outs = module(*inputs)
    outs = jax.block_until_ready(outs)

    # Sanity check against plain-JAX LayerNorm reference.
    def ref_ln(t):
        mean = jnp.mean(t, axis=-1, keepdims=True)
        var = jnp.mean((t - mean) ** 2, axis=-1, keepdims=True)
        return (t - mean) / jnp.sqrt(var + EPS) * module.weight + module.bias

    for got, t in zip(outs, inputs):
        ref = ref_ln(t)
        assert got.shape == t.shape
        assert jnp.max(jnp.abs(got - ref)) < 1e-4, "mismatch vs reference"

    print("KERNEL_OK")
</pallas_src>

<mosaic_0001>
module attributes {stable_mosaic.version = 11 : i64} {
  func.func @_layernorm_kernel(%arg0: i32, %arg1: memref<56x128xf32, #tpu.memory_space<vmem>>, %arg2: memref<2x128xf32, #tpu.memory_space<vmem>>, %arg3: memref<56x128xf32, #tpu.memory_space<vmem>>) attributes {dimension_semantics = [#tpu.dimension_semantics<parallel>], iteration_bounds = array<i64: 2>, scalar_prefetch = 0 : i64, scratch_operands = 0 : i64, tpu.core_type = #tpu.core_type<tc>, window_params = [{transform_indices = @transform_0, window_bounds = array<i64: 56, 128>}, {pipeline_mode = #tpu.pipeline_mode<synchronous>, transform_indices = @transform_1, window_bounds = array<i64: 2, 128>}, {transform_indices = @transform_2, window_bounds = array<i64: 56, 128>}]} {
    %c0 = arith.constant 0 : index
    %c0_0 = arith.constant 0 : index
    %0 = vector.load %arg1[%c0, %c0_0] : memref<56x128xf32, #tpu.memory_space<vmem>>, vector<56x128xf32>
    %cst = arith.constant dense<0.000000e+00> : vector<56xf32>
    %1 = vector.multi_reduction <add>, %0, %cst [1] : vector<56x128xf32> to vector<56xf32>
    %2 = vector.shape_cast %1 : vector<56xf32> to vector<56x1xf32>
    %cst_1 = arith.constant 1.280000e+02 : f32
    %3 = vector.broadcast %cst_1 : f32 to vector<56x1xf32>
    %4 = arith.divf %2, %3 : vector<56x1xf32>
    %5 = vector.broadcast %4 : vector<56x1xf32> to vector<56x128xf32>
    %6 = arith.subf %0, %5 : vector<56x128xf32>
    %7 = arith.mulf %6, %6 : vector<56x128xf32>
    %cst_2 = arith.constant dense<0.000000e+00> : vector<56xf32>
    %8 = vector.multi_reduction <add>, %7, %cst_2 [1] : vector<56x128xf32> to vector<56xf32>
    %9 = vector.shape_cast %8 : vector<56xf32> to vector<56x1xf32>
    %cst_3 = arith.constant 1.280000e+02 : f32
    %10 = vector.broadcast %cst_3 : f32 to vector<56x1xf32>
    %11 = arith.divf %9, %10 : vector<56x1xf32>
    %cst_4 = arith.constant 9.99999974E-6 : f32
    %12 = vector.broadcast %cst_4 : f32 to vector<56x1xf32>
    %13 = arith.addf %11, %12 : vector<56x1xf32>
    %14 = math.rsqrt %13 : vector<56x1xf32>
    %c0_5 = arith.constant 0 : index
    %c0_6 = arith.constant 0 : index
    %15 = vector.load %arg2[%c0_5, %c0_6] : memref<2x128xf32, #tpu.memory_space<vmem>>, vector<1x128xf32>
    %c1 = arith.constant 1 : index
    %c0_7 = arith.constant 0 : index
    %16 = vector.load %arg2[%c1, %c0_7] : memref<2x128xf32, #tpu.memory_space<vmem>>, vector<1x128xf32>
    %17 = vector.broadcast %14 : vector<56x1xf32> to vector<56x128xf32>
    %18 = arith.mulf %6, %17 : vector<56x128xf32>
    %19 = vector.broadcast %15 : vector<1x128xf32> to vector<56x128xf32>
    %20 = arith.mulf %18, %19 : vector<56x128xf32>
    %21 = vector.broadcast %16 : vector<1x128xf32> to vector<56x128xf32>
    %22 = arith.addf %20, %21 : vector<56x128xf32>
    %c0_8 = arith.constant 0 : index
    %c0_9 = arith.constant 0 : index
    %23 = vector.load %arg3[%c0_8, %c0_9] : memref<56x128xf32, #tpu.memory_space<vmem>>, vector<56x128xf32>
    tpu.vector_store %arg3[%c0_8, %c0_9], %22 {strides = array<i32>} : memref<56x128xf32, #tpu.memory_space<vmem>>, vector<56x128xf32>,
    return
  }
  func.func @transform_0(%arg0: i32) -> (i32, i32) {
    %c0_i32 = arith.constant 0 : i32
    %c0_i32_0 = arith.constant 0 : i32
    return %arg0, %c0_i32 : i32, i32
  }
  func.func @transform_1(%arg0: i32) -> (i32, i32) {
    %c0_i32 = arith.constant 0 : i32
    %c0_i32_0 = arith.constant 0 : i32
    %c0_i32_1 = arith.constant 0 : i32
    return %c0_i32, %c0_i32_0 : i32, i32
  }
  func.func @transform_2(%arg0: i32) -> (i32, i32) {
    %c0_i32 = arith.constant 0 : i32
    %c0_i32_0 = arith.constant 0 : i32
    return %arg0, %c0_i32 : i32, i32
  }
}

</mosaic_0001>

<bundles_post_ra>
// kernel: tpu_custom_call.1
= control target key start
LH: loop header
LB: loop body
LE: loop exit
PB: predicated region body
PF: predicated region fallthrough
CT: control target
= control target key end

     0   :  { %7 = vsyncpa [#allocation3], 0  ;;  %s960_s0 = inlined_call_operand.hbm [shape: f32[112,128], index: 0, kind: input, shape index: {}]   ;;  %s961_s1 = inlined_call_operand.hbm [shape: f32[2,128], index: 1, kind: input, shape index: {}]   ;;  %s962_s2 = inlined_call_operand.hbm [shape: f32[112,128], index: 2, kind: output, shape index: {}]  }
   0x1   :  { %9 = vsyncpa [#allocation3 + $0x1], 0 }
   0x2   :  { %10 = vsyncpa [#allocation6], 0 }
   0x3   :  { %11 = vsyncpa [#allocation4], 0 }
   0x4   :  { %13 = vsyncpa [#allocation4 + $0x1], 0  ;;  %s706_s9 = smov 0   ;;  %s708_s10 = smov 0  }
   0x5   :  { %s710_s11 = smov 0   ;;  %s712_s12 = smov 0  }
   0x6 LB: > { %s727_s13 = sadd.s32 4294967295, %s683_s12   ;;  %s459_s14 = sadd.s32 4294967294, %s683_s12   ;;  %s683_s12 = sphi %s712_s12, %s973_s12   ;;  %s679_s11 = sphi %s710_s11, %s972_s11   ;;  %s675_s10 = sphi %s708_s10, %s971_s10   ;;  %s671_s9 = sphi %s706_s9, %s970_s9  }
   0x7   : > { %s731_s15 = sadd.s32 1, %s683_s12   ;;  %s26_s16 = sadd.s32 1, %s679_s11 }
   0x8   : > { %s23_s17 = ssub.s32 %s683_s12, %s731_s15  ;;  %p33_p0 = scmp.ne.s32.totalorder %s679_s11, %s675_s10 }
   0x9   : > { %p24_p1 = scmp.eq.s32.totalorder %s23_s17, 0  ;;  %p34_p2 = scmp.eq.s32.totalorder %s683_s12, 0 }
   0xa   : > { %p39_p3 = scmp.ne.s32.totalorder %s675_s10, %s671_s9  ;;  %p40_p4 = scmp.eq.s32.totalorder %s727_s13, 0 }
   0xb   : > { %s743_s18 = scalar_select %p24_p1, %s679_s11, %s26_s16  }
   0xc   : > { %p745_p5 = por %p34_p2, %p33_p0  ;;  %p751_p6 = por %p40_p4, %p39_p3 }
   0xd   : > { %p84_p7 = scmp.eq.s32.totalorder %s727_s13, 1  ;;  %p90_p8 = scmp.eq.s32.totalorder %s459_s14, 1 }
   0xe   : > { %p460_p9 = scmp.ge.s32.totalorder %s683_s12, 1  ;;  %p97_p10 = scmp.lt.s32.totalorder %s683_s12, 3 }
   0xf   : > { %p758_p11 = por %p84_p7, %p33_p0  ;;  %p762_p12 = por %p90_p8, %p39_p3 }
  0x10   : > { %p766_p13 = pnand %p460_p9, %p97_p10  ;;  %s109_s26 = sshll.u32 %s961_s1, 4  ;;  %s110_s26 = int_to_ptr.hbm [resolvable:$true] %s109_s26 }
  0x11   : > { %s685_s27 = smov [#allocation5]   ;;  %p494_p3 = scmp.lt.s32.totalorder %s683_s12, 2 }
  0x12   : > { %p481_p1 = pneg %p766_p13  ;;  %s111_s28 = sshll.u32 %s685_s27, 4  ;;  %s112_s28 = int_to_ptr.vmem [resolvable:$true] %s111_s28 }
  0x13   : > { %s122_s29 = sand.u32 1, %s679_s11   ;;  %p782_p7 = pnand %p494_p3, %p745_p5 }
  0x14   : > { %p482_p2 = pnand %p481_p1, %p40_p4  ;;  %s471_s3 = smul.u32 56, %s122_s29 }
  0x15   : > { %s469_s4 = smul.u32 56, %s683_s12  ;;  %s123_s17 = scalar_lea.sflag [#allocation3], %s122_s29 }
  0x16   : > { %484 = dma.hbm_to_vmem [thread:$0]  (!%p482_p2), %s110_s26, 32, %s112_s28, [#allocation6]  }
  0x17   : > { %s131_s7 = scalar_lea.hbm %s960_s0, %s469_s4  ;;  %s126_s8 = scalar_lea.vmem [#allocation2], %s471_s3 }
  0x18   : > { %s134_s14 = sshll.u32 %s126_s8, 4  ;;  %s132_s16 = sshll.u32 %s131_s7, 4  ;;  %s135_s14 = int_to_ptr.vmem [resolvable:$true] %s134_s14  ;;  %s133_s16 = int_to_ptr.hbm [resolvable:$true] %s132_s16 }
  0x19   : > { %s583_s24 = sshra.s32 %s133_s16, 4  ;;  %p587_p8 = pneg %p782_p7  ;;  %s584_s24 = int_to_ptr.hbm [resolvable:$true] %s583_s24 }
  0x1a   : > { %s585_s19 = scalar_lea.hbm %s584_s24, 56  ;;  %s590_s27 = scalar_lea.hbm %s960_s0, 112 }
  0x1b   : > { %p586_p5 = scmp.ne.s32.totalorder %s584_s24, %s585_s19  ;;  %p591_p1 = scmp.lt.s32.totalorder %s584_s24, %s960_s0 }
  0x1c   : > { %p592_p2 = scmp.lt.s32.totalorder %s590_s27, %s585_s19 }
  0x1d   : > { %p588_p9 = pnand %p587_p8, %p586_p5 }
  0x1e   : > { %p593_p3 = por %p592_p2, %p591_p1 }
  0x1f   : > { %p589_p10 = pneg %p588_p9 }
  0x21   : > { %p594_p0 = pnand %p593_p3, %p589_p10 }
  0x23   : > { %597 = shalt.err (!%p594_p0)
}
  0x24   : > { %s686_s29 = smov 128   ;;  %s687_s3 = smov 8  }
  0x25   : > { %488 = dma.hbm_to_vmem [thread:$0]  (!%p782_p7), %s133_s16, 896, %s135_s14, %s123_s17, %s686_s29, %s686_s29, %s687_s3  }
  0x26   : > { %146 = sbr.rel (%p766_p13) target bundleno = 335 (0x14f), region = 28  ;;  %s803_s5 = sand.u32 (!%p766_p13), 1, %s675_s10  }
  0x27   : > { %s472_s6 = smul.u32 (!%p766_p13), 56, %s803_s5  ;;  %s149_s7 = scalar_lea.sflag (!%p766_p13), [#allocation3], %s803_s5 }
  0x29   : > { %s152_s8 = scalar_lea.vmem (!%p766_p13), [#allocation2], %s472_s6 }
  0x2b   : > { %658 = dma.done.wait (%p751_p6), %s149_s7, 896  }
  0x2c   : > { %660 = vsyncadd (%p751_p6), %s149_s7, 4294966400 }
  0x2d   : > { %662 = dma.done.wait (%p40_p4), [#allocation6], 32  }
  0x2e   : > { %664 = vsyncadd (%p40_p4), [#allocation6], 4294967264  ;;  %v185_v0 = vld [vmem:[%s152_s8 + $0x20] sm:$0xff]  ;;  %v183_v1 = vld [vmem:[%s152_s8 + $0x10] sm:$0xff]  ;;  %v688_v7 = vmov 128.0   ;;  %s893_s20 = scalar_lea.vmem [#allocation7], %s472_s6 }
  0x2f   : > { %v181_v2 = vld [vmem:[%s152_s8] sm:$0xff]  ;;  %196 = vadd.xlane.f32.xlu2 %v185_v0  ;;  %192 = vadd.xlane.f32.xlu1 %v183_v1  ;;  %v186_v3 = vld [vmem:[%s152_s8 + $0x28] sm:$0xff]  ;;  %v184_v4 = vld [vmem:[%s152_s8 + $0x18] sm:$0xff]  ;;  %537 = vrcp.f32 %v688_v7  ;;  %s470_s23 = smul.u32 56, %s727_s13  ;;  %s373_s16 = sshll.u32 %s893_s20, 4  ;;  %s374_s16 = int_to_ptr.vmem [resolvable:$true] %s373_s16 }
  0x30   : > { %188 = vadd.xlane.f32.xlu0 %v181_v2  ;;  %v182_v5 = vld [vmem:[%s152_s8 + $0x8] sm:$0xff]  ;;  %v187_v6 = vld [vmem:[%s152_s8 + $0x30] sm:$0xff]  ;;  %s361_s24 = scalar_lea.sflag [#allocation4], %s803_s5  ;;  %s633_s28 = scalar_lea.hbm %s962_s2, 112 }
  0x31   : > { %s372_s14 = scalar_lea.hbm %s962_s2, %s470_s23 }
  0x32   : > { %s375_s17 = sshll.u32 %s372_s14, 4  ;;  %s376_s17 = int_to_ptr.hbm [resolvable:$true] %s375_s17 }
  0x33   : > { %s627_s19 = sshra.s32 %s376_s17, 4  ;;  %s628_s19 = int_to_ptr.hbm [resolvable:$true] %s627_s19 }
  0x34   : > { %s629_s25 = scalar_lea.hbm %s628_s19, 56  ;;  %p634_p0 = scmp.lt.s32.totalorder %s628_s19, %s962_s2 }
  0x35   : > { %v538_v8 = vpop.eup %537  ;;  %p630_p4 = scmp.ne.s32.totalorder %s628_s19, %s629_s25  ;;  %p635_p7 = scmp.lt.s32.totalorder %s633_s28, %s629_s25 }
  0x36   : > { %v203_v9 = vmul.f32 128.0, %v538_v8  ;;  %vm207_vm0 = vweird.f32 %v538_v8 }
  0x37   : > { %198 = vadd.xlane.f32.xlu2 %v186_v3  ;;  %194 = vadd.xlane.f32.xlu1 %v184_v4  ;;  %p631_p6 = pnand %p630_p4, %p758_p11  ;;  %p636_p5 = por %p635_p7, %p634_p0 }
  0x38   : > { %190 = vadd.xlane.f32.xlu0 %v182_v5  ;;  %v204_v10 = vsub.f32 1.0, %v203_v9 }
  0x39   : > { %p632_p13 = pneg %p631_p6 }
  0x3a   : > { %v205_v11 = vmul.f32 %v538_v8, %v204_v10 }
  0x3b   : > { %p637_p8 = pnand %p636_p5, %p632_p13 }
  0x3c   : > { %v206_v12 = vadd.f32 %v538_v8, %v205_v11 }
  0x3e   : > { %v817_v13 = vsel %vm207_vm0, %v538_v8, %v206_v12 }
  0x40   : > { %200 = vadd.xlane.f32.xlu0 %v187_v6 }
  0xa2   : > { %v197_v14 = vpop.xlane.xlu2 %196  ;;  %v193_v15 = vpop.xlane.xlu1 %192 }
  0xa3   : > { %v211_v16 = vmul.f32 %v817_v13, %v193_v15  ;;  %v189_v17 = vpop.xlane.xlu0 %188  ;;  %v213_v34 = vmul.f32 %v817_v13, %v197_v14  ;;  %v873_v14 = vld [vmem:[#allocation5] ss:$0 sm:$0xff] }
  0xa4   : > { %v209_v18 = vmul.f32 %v817_v13, %v189_v17 }
  0xa5   : > { %v821_v19 = vsub.f32 %v183_v1, %v211_v16  ;;  %v845_v37 = vsub.f32 %v185_v0, %v213_v34 }
  0xa6   : > { %v823_v20 = vsub.f32 %v181_v2, %v209_v18 }
  0xa7   : > { %v225_v21 = vmul.f32 %v821_v19, %v821_v19  ;;  %v227_v40 = vmul.f32 %v845_v37, %v845_v37 }
  0xa8   : > { %v223_v22 = vmul.f32 %v823_v20, %v823_v20 }
  0xa9   : > { %234 = vadd.xlane.f32.xlu0 %v225_v21 }
  0xaa   : > { %230 = vadd.xlane.f32.xlu1 %v223_v22  ;;  %v199_v23 = vpop.xlane.xlu2 %198  ;;  %v195_v24 = vpop.xlane.xlu1 %194  ;;  %v880_v22 = vld [vmem:[#allocation5 + $0x1] ss:$0 sm:$0xff] }
  0xab   : > { %v214_v25 = vmul.f32 %v817_v13, %v199_v23  ;;  %v212_v26 = vmul.f32 %v817_v13, %v195_v24  ;;  %v191_v27 = vpop.xlane.xlu0 %190 }
  0xac   : > { %v210_v28 = vmul.f32 %v817_v13, %v191_v27 }
  0xad   : > { %v832_v29 = vsub.f32 %v186_v3, %v214_v25  ;;  %v834_v30 = vsub.f32 %v184_v4, %v212_v26 }
  0xae   : > { %v836_v31 = vsub.f32 %v182_v5, %v210_v28 }
  0xaf   : > { %v228_v32 = vmul.f32 %v832_v29, %v832_v29  ;;  %v226_v33 = vmul.f32 %v834_v30, %v834_v30 }
  0xb0   : > { %v224_v35 = vmul.f32 %v836_v31, %v836_v31 }
  0xb1   : > { %240 = vadd.xlane.f32.xlu0 %v228_v32 }
  0xb2   : > { %236 = vadd.xlane.f32.xlu1 %v226_v33  ;;  %232 = vadd.xlane.f32.xlu2 %v224_v35 }
  0xb3   : > { %v201_v36 = vpop.xlane.xlu0 %200 }
  0xb4   : > { %v215_v38 = vmul.f32 %v817_v13, %v201_v36 }
  0xb6   : > { %v848_v39 = vsub.f32 %v187_v6, %v215_v38 }
  0xb8   : > { %v229_v41 = vmul.f32 %v848_v39, %v848_v39 }
  0xba   : > { %238 = vadd.xlane.f32.xlu2 %v227_v40  ;;  %242 = vadd.xlane.f32.xlu1 %v229_v41 }
 0x11c   : > { %v235_v42 = vpop.xlane.xlu0 %234 }
 0x11d   : > { %v231_v43 = vpop.xlane.xlu1 %230  ;;  %v246_v44 = vmul.f32 %v235_v42, %v817_v13 }
 0x11e   : > { %v244_v45 = vmul.f32 %v231_v43, %v817_v13 }
 0x11f   : > { %v253_v46 = vadd.f32 1e-05, %v246_v44 }
 0x120   : > { %v251_v47 = vadd.f32 1e-05, %v244_v45 }
 0x121   : > { %539 = vrsqrt.f32 %v253_v46  ;;  %vm284_vm3 = vweird.f32 %v253_v46 }
 0x122   : > { %541 = vrsqrt.f32 %v251_v47  ;;  %vm264_vm4 = vweird.f32 %v251_v47 }
 0x124   : > { %v241_v48 = vpop.xlane.xlu0 %240 }
 0x125   : > { %v237_v49 = vpop.xlane.xlu1 %236  ;;  %v233_v50 = vpop.xlane.xlu2 %232  ;;  %v249_v51 = vmul.f32 %v241_v48, %v817_v13 }
 0x126   : > { %v247_v52 = vmul.f32 %v237_v49, %v817_v13  ;;  %v245_v53 = vmul.f32 %v233_v50, %v817_v13 }
 0x127   : > { %v540_v54 = vpop.eup %539  ;;  %v859_v55 = vadd.f32 1e-05, %v249_v51 }
 0x128   : > { %v542_v56 = vpop.eup %541  ;;  %v279_v57 = vmul.f32 %v540_v54, %v253_v46  ;;  %v861_v58 = vadd.f32 1e-05, %v247_v52  ;;  %v863_v59 = vadd.f32 1e-05, %v245_v53  ;;  %vm285_vm1 = vweird.f32 %v540_v54 }
 0x129   : > { %v259_v60 = vmul.f32 %v542_v56, %v251_v47  ;;  %543 = vrsqrt.f32 %v859_v55  ;;  %vm265_vm2 = vweird.f32 %v542_v56  ;;  %vm286_vm5 = vmor %vm284_vm3, %vm285_vm1  ;;  %vm314_vm7 = vweird.f32 %v859_v55 }
 0x12a   : > { %v280_v61 = vmul.f32 %v540_v54, %v279_v57  ;;  %545 = vrsqrt.f32 %v861_v58  ;;  %vm266_vm6 = vmor %vm264_vm4, %vm265_vm2  ;;  %vm294_vm11 = vweird.f32 %v861_v58  ;;  %vm274_vm14 = vweird.f32 %v863_v59 }
 0x12b   : > { %v260_v62 = vmul.f32 %v542_v56, %v259_v60  ;;  %547 = vrsqrt.f32 %v863_v59 }
 0x12c   : > { %v281_v63 = vmul.f32 0.5, %v280_v61 }
 0x12d   : > { %v261_v0 = vmul.f32 0.5, %v260_v62  ;;  %v239_v1 = vpop.xlane.xlu2 %238  ;;  %v243_v2 = vpop.xlane.xlu1 %242 }
 0x12e   : > { %v282_v3 = vsub.f32 1.5, %v281_v63  ;;  %v248_v4 = vmul.f32 %v239_v1, %v817_v13  ;;  %v250_v5 = vmul.f32 %v243_v2, %v817_v13 }
 0x12f   : > { %v544_v6 = vpop.eup %543  ;;  %v262_v7 = vsub.f32 1.5, %v261_v0 }
 0x130   : > { %v546_v8 = vpop.eup %545  ;;  %v283_v9 = vmul.f32 %v540_v54, %v282_v3  ;;  %v309_v10 = vmul.f32 %v544_v6, %v859_v55  ;;  %v871_v11 = vadd.f32 1e-05, %v248_v4  ;;  %v877_v13 = vadd.f32 1e-05, %v250_v5 }
 0x131   : > { %v548_v12 = vpop.eup %547  ;;  %v263_v15 = vmul.f32 %v542_v56, %v262_v7  ;;  %v289_v16 = vmul.f32 %v546_v8, %v861_v58  ;;  %vm315_vm8 = vweird.f32 %v544_v6  ;;  %vm295_vm9 = vweird.f32 %v546_v8 }
 0x132   : > { %v287_v17 = vsel %vm286_vm5, %v540_v54, %v283_v9  ;;  %v269_v18 = vmul.f32 %v548_v12, %v863_v59  ;;  %v310_v21 = vmul.f32 %v544_v6, %v309_v10  ;;  %549 = vrsqrt.f32 %v871_v11  ;;  %vm316_vm12 = vmor %vm314_vm7, %vm315_vm8 }
 0x133   : > { %v267_v23 = vsel %vm266_vm6, %v542_v56, %v263_v15  ;;  %v332_v24 = vmul.f32 %v287_v17, %v821_v19  ;;  %v290_v25 = vmul.f32 %v546_v8, %v289_v16  ;;  %551 = vrsqrt.f32 %v877_v13  ;;  %vm296_vm13 = vmor %vm294_vm11, %vm295_vm9 }
 0x134   : > { %v330_v26 = vmul.f32 %v267_v23, %v823_v20  ;;  %v270_v27 = vmul.f32 %v548_v12, %v269_v18  ;;  %v311_v28 = vmul.f32 0.5, %v310_v21  ;;  %vm275_vm10 = vweird.f32 %v548_v12 }
 0x135   : > { %v340_v32 = vmul.f32 %v873_v14, %v332_v24  ;;  %v291_v33 = vmul.f32 0.5, %v290_v25  ;;  %vm276_vm15 = vmor %vm274_vm14, %vm275_vm10  ;;  %vm304_vm1 = vweird.f32 %v871_v11  ;;  %vm324_vm4 = vweird.f32 %v877_v13 }
 0x136   : > { %v338_v34 = vmul.f32 %v873_v14, %v330_v26  ;;  %v271_v35 = vmul.f32 0.5, %v270_v27  ;;  %v312_v36 = vsub.f32 1.5, %v311_v28 }
 0x137   : > { %v348_v19 = vadd.f32 %v880_v22, %v340_v32  ;;  %v292_v38 = vsub.f32 1.5, %v291_v33 }
 0x138   : > { %v346_v20 = vadd.f32 %v880_v22, %v338_v34  ;;  %v272_v40 = vsub.f32 1.5, %v271_v35  ;;  %v313_v41 = vmul.f32 %v544_v6, %v312_v36  ;;  %v550_v42 = vpop.eup %549 }
 0x139   : > { %355 = vst [vmem:[%s893_s20 + $0x10] sm:$0xff] %v348_v19  ;;  %v293_v43 = vmul.f32 %v546_v8, %v292_v38  ;;  %v299_v46 = vmul.f32 %v550_v42, %v871_v11  ;;  %v552_v47 = vpop.eup %551  ;;  %vm305_vm0 = vweird.f32 %v550_v42 }
 0x13a   : > { %353 = vst [vmem:[%s893_s20] sm:$0xff] %v346_v20  ;;  %v273_v44 = vmul.f32 %v548_v12, %v272_v40  ;;  %v317_v45 = vsel %vm316_vm12, %v544_v6, %v313_v41  ;;  %v319_v53 = vmul.f32 %v552_v47, %v877_v13  ;;  %vm325_vm2 = vweird.f32 %v552_v47  ;;  %vm306_vm3 = vmor %vm304_vm1, %vm305_vm0 }
 0x13b   : > { %v297_v48 = vsel %vm296_vm13, %v546_v8, %v293_v43  ;;  %v335_v49 = vmul.f32 %v317_v45, %v832_v29  ;;  %v300_v52 = vmul.f32 %v550_v42, %v299_v46  ;;  %vm326_vm5 = vmor %vm324_vm4, %vm325_vm2 }
 0x13c   : > { %v333_v50 = vmul.f32 %v297_v48, %v834_v30  ;;  %v277_v51 = vsel %vm276_vm15, %v548_v12, %v273_v44  ;;  %v320_v58 = vmul.f32 %v552_v47, %v319_v53 }
 0x13d   : > { %v331_v54 = vmul.f32 %v277_v51, %v836_v31  ;;  %v343_v55 = vmul.f32 %v873_v14, %v335_v49  ;;  %v301_v57 = vmul.f32 0.5, %v300_v52 }
 0x13e   : > { %v341_v56 = vmul.f32 %v873_v14, %v333_v50  ;;  %v321_v61 = vmul.f32 0.5, %v320_v58 }
 0x13f   : > { %v339_v29 = vmul.f32 %v873_v14, %v331_v54  ;;  %v351_v59 = vadd.f32 %v880_v22, %v343_v55  ;;  %v302_v60 = vsub.f32 1.5, %v301_v57 }
 0x140   : > { %v349_v30 = vadd.f32 %v880_v22, %v341_v56  ;;  %v322_v63 = vsub.f32 1.5, %v321_v61 }
 0x141   : > { %v347_v62 = vadd.f32 %v880_v22, %v339_v29  ;;  %358 = vst [vmem:[%s893_s20 + $0x28] sm:$0xff] %v351_v59  ;;  %v303_v31 = vmul.f32 %v550_v42, %v302_v60 }
 0x142   : > { %356 = vst [vmem:[%s893_s20 + $0x18] sm:$0xff] %v349_v30  ;;  %v323_v1 = vmul.f32 %v552_v47, %v322_v63 }
 0x143   : > { %354 = vst [vmem:[%s893_s20 + $0x8] sm:$0xff] %v347_v62  ;;  %v307_v0 = vsel %vm306_vm3, %v550_v42, %v303_v31 }
 0x144   : > { %v334_v2 = vmul.f32 %v307_v0, %v845_v37  ;;  %v327_v3 = vsel %vm326_vm5, %v552_v47, %v323_v1 }
 0x145   : > { %v336_v5 = vmul.f32 %v327_v3, %v848_v39 }
 0x146   : > { %v342_v4 = vmul.f32 %v873_v14, %v334_v2 }
 0x147   : > { %v344_v7 = vmul.f32 %v873_v14, %v336_v5 }
 0x148   : > { %v350_v6 = vadd.f32 %v880_v22, %v342_v4 }
 0x149   : > { %v352_v8 = vadd.f32 %v880_v22, %v344_v7 }
 0x14a   : > { %357 = vst [vmem:[%s893_s20 + $0x20] sm:$0xff] %v350_v6 }
 0x14b   : > { %359 = vst [vmem:[%s893_s20 + $0x30] sm:$0xff] %v352_v8 }
 0x14c   : > { %640 = shalt.err (!%p637_p8)
}
 0x14d   : > { %s689_s3 = smov 128   ;;  %s690_s5 = smov 8  }
 0x14e   : > { %479 = dma.vmem_to_hbm [thread:$0]  (%p758_p11), %s374_s16, 896, %s376_s17, %s361_s24, %s689_s3, %s689_s3, %s690_s5  }
 0x14f PF: > { %s390_s6 = sand.u32 1, %s671_s9   ;;  %p969_p9 = scmp.ge.s32.totalorder %s683_s12, 2 }
 0x150   : > { %s391_s7 = scalar_lea.sflag [#allocation4], %s390_s6 }
 0x151   : > { %p490_p10 = pnand %p969_p9, %p762_p12 }
 0x153   : > { %p491_p1 = pneg %p490_p10 }
 0x155   : > { %666 = dma.done.wait (%p491_p1), %s391_s7, 896  }
 0x156   : > { %668 = vsyncadd (%p491_p1), %s391_s7, 4294966400  ;;  %p16_p2 = scmp.ge.s32.totalorder %s731_s15, 4   ;;  %s970_s9 = smov %s675_s10 }
 0x157   : > { %s971_s10 = smov %s679_s11  ;;  %s972_s11 = smov %s743_s18 }
 0x158   : > { %s973_s12 = smov %s731_s15  ;;  %18 = sbr.rel (!%p16_p2) target bundleno = 6 (0x6), region = 77 }
 0x15d   :  { %397 = vsyncpa [#allocation3], 1 }
 0x15e   :  { %399 = vsyncpa [#allocation3 + $0x1], 1 }
 0x15f   :  { %400 = vsyncpa [#allocation6], 1 }
 0x160   :  { %401 = vsyncpa [#allocation4], 1 }
 0x161   :  { %403 = vsyncpa [#allocation4 + $0x1], 1 }

</bundles_post_ra>
